<compile_context>
chip_gen: v5e
topology: v5e:2x2
jax: 0.10.0
libtpu: 0.0.40
codegen_flags: <defaults>
</compile_context>

<pallas_src>
import jax
import jax.numpy as jnp
from jax.experimental import pallas as pl
from jax.experimental.pallas import tpu as pltpu


def _max_pool_kernel(x_ref, m_ref, o_ref):
    """One (tB, tL, tH) tile of the masked-max reduction.

    x_ref: (tB, tL, tH) tile of last_hidden_state
    m_ref: (tB, tL, 1)  tile of attention_mask (L on sublanes, matching x)
    o_ref: (tB, tH)     running-max accumulator, resident across the L grid axis
    """
    l_step = pl.program_id(2)

    @pl.when(l_step == 0)
    def _init():
        # -inf init makes the tiled accumulation exactly equivalent to
        # "set masked positions to -10000 then max over all L".
        o_ref[...] = jnp.full_like(o_ref, -jnp.inf)

    x = x_ref[...]                                    # (tB, tL, tH)
    valid = m_ref[...] != 0                           # (tB, tL, 1), native int compare
    neg = jnp.asarray(-10000.0, dtype=x.dtype)
    masked = jnp.where(valid, x, neg)                 # lane-broadcast of mask over H
    o_ref[...] = jnp.maximum(o_ref[...], jnp.max(masked, axis=1))   # (tB, tH)


def _choose_tile(dim, candidates):
    """Largest candidate that evenly divides `dim`; else the full dim (always legal)."""
    for c in candidates:
        if c <= dim and dim % c == 0:
            return c
    return dim


def max_pooling(last_hidden_state, attention_mask):
    """Pallas implementation of the PyTorch MaxPooling.forward.

    Args:
      last_hidden_state: [B, L, H] float array.
      attention_mask:    [B, L] array (0 = padded, nonzero = valid).
    Returns:
      [B, H] array, same dtype as last_hidden_state.
    """
    B, L, H = last_hidden_state.shape
    assert attention_mask.shape == (B, L)

    x = last_hidden_state
    # (B, L, 1): puts L on the sublane axis, same as x, so the broadcast over the
    # H (lane) axis inside the kernel is free of cross-lane relayouts.
    mask3 = attention_mask.reshape(B, L, 1)

    itemsize = jnp.dtype(x.dtype).itemsize

    # ---- Tile selection --------------------------------------------------
    # Sublane-dense output: 8 batch rows per block when possible.
    tB = 8 if B % 8 == 0 else B
    # Lane-dense H tiles (multiples of 128); fall back to full H for small H.
    tH = _choose_tile(H, (512, 384, 256, 128))
    # Reduction (L) tile: multiple of 8, capped so one x tile stays <= ~4 MiB.
    budget_bytes = 4 * 1024 * 1024
    max_tl = max(8, budget_bytes // (tB * tH * itemsize))
    l_candidates = tuple(
        c for c in (2048, 1024, 512, 256, 128, 64, 32, 16, 8) if c <= max_tl
    )
    tL = _choose_tile(L, l_candidates)

    grid = (B // tB, H // tH, L // tL)

    return pl.pallas_call(
        _max_pool_kernel,
        out_shape=jax.ShapeDtypeStruct((B, H), x.dtype),
        grid_spec=pltpu.PrefetchScalarGridSpec(
            num_scalar_prefetch=0,
            grid=grid,
            in_specs=[
                pl.BlockSpec((tB, tL, tH), lambda b, h, l: (b, l, h)),
                pl.BlockSpec((tB, tL, 1), lambda b, h, l: (b, l, 0)),
            ],
            out_specs=pl.BlockSpec((tB, tH), lambda b, h, l: (b, h)),
        ),
        compiler_params=pltpu.CompilerParams(
            # B- and H-tiles are independent (megacore / 2-TC friendly on v7x);
            # L is the reduction axis feeding the resident accumulator.
            dimension_semantics=("parallel", "parallel", "arbitrary"),
            vmem_limit_bytes=32 * 1024 * 1024,
        ),
    )(x, mask3)


def _reference(last_hidden_state, attention_mask):
    """Plain-JAX mirror of the PyTorch forward for verification."""
    mask = attention_mask[..., None].astype(jnp.float32)
    neg = jnp.asarray(-10000.0, dtype=last_hidden_state.dtype)
    emb = jnp.where(mask == 0.0, neg, last_hidden_state)
    return jnp.max(emb, axis=1)


if __name__ == "__main__":
    key = jax.random.PRNGKey(0)
    k1, k2 = jax.random.split(key)

    # --- Small demo shape implied by the module ---------------------------
    B, L, H = 2, 8, 32
    x_small = jax.random.normal(k1, (B, L, H), dtype=jnp.float32)
    lengths = jnp.array([L, L // 2], dtype=jnp.int32)          # batch 0 full, batch 1 half
    pos = jnp.arange(L, dtype=jnp.int32)[None, :]
    mask_small = (pos < lengths[:, None]).astype(jnp.int32)

    out = jax.block_until_ready(max_pooling(x_small, mask_small))
    ref = _reference(x_small, mask_small)
    assert out.shape == (B, H)
    assert jnp.allclose(out, ref, atol=1e-6), "mismatch vs reference (small)"

    # --- Larger shape exercising the tiled (B, H-tiles, L-tiles) grid -----
    B2, L2, H2 = 8, 512, 768
    x_big = jax.random.normal(k2, (B2, L2, H2), dtype=jnp.float32)
    lengths2 = jnp.array([L2, 3, 100, 0, 512, 257, 31, 1], dtype=jnp.int32)  # one fully-masked row
    pos2 = jnp.arange(L2, dtype=jnp.int32)[None, :]
    mask_big = (pos2 < lengths2[:, None]).astype(jnp.int32)

    out2 = jax.block_until_ready(max_pooling(x_big, mask_big))
    ref2 = _reference(x_big, mask_big)
    assert out2.shape == (B2, H2)
    assert jnp.allclose(out2, ref2, atol=1e-6), "mismatch vs reference (tiled)"

    print("KERNEL_OK")
</pallas_src>

<mosaic_0001>
module attributes {stable_mosaic.version = 11 : i64} {
  func.func @_max_pool_kernel(%arg0: i32, %arg1: i32, %arg2: i32, %arg3: memref<2x8x32xf32, #tpu.memory_space<vmem>>, %arg4: memref<2x8x1xi32, #tpu.memory_space<vmem>>, %arg5: memref<2x32xf32, #tpu.memory_space<vmem>>) attributes {dimension_semantics = [#tpu.dimension_semantics<parallel>, #tpu.dimension_semantics<parallel>, #tpu.dimension_semantics<arbitrary>], iteration_bounds = array<i64: 1, 1, 1>, scalar_prefetch = 0 : i64, scratch_operands = 0 : i64, tpu.core_type = #tpu.core_type<tc>, window_params = [{transform_indices = @transform_0, window_bounds = array<i64: 2, 8, 32>}, {transform_indices = @transform_1, window_bounds = array<i64: 2, 8, 1>}, {transform_indices = @transform_2, window_bounds = array<i64: 2, 32>}]} {
    %c0_i32 = arith.constant 0 : i32
    %0 = arith.cmpi eq, %arg2, %c0_i32 : i32
    %1 = arith.extui %0 : i1 to i32
    %c0_i32_0 = arith.constant 0 : i32
    %2 = arith.cmpi ne, %1, %c0_i32_0 : i32
    scf.if %2 {
      %cst_12 = arith.constant 0xFF800000 : f32
      %15 = vector.broadcast %cst_12 : f32 to vector<2x32xf32>
      %c0_13 = arith.constant 0 : index
      %c0_14 = arith.constant 0 : index
      %16 = vector.load %arg5[%c0_13, %c0_14] : memref<2x32xf32, #tpu.memory_space<vmem>>, vector<2x32xf32>
      tpu.vector_store %arg5[%c0_13, %c0_14], %15 {strides = array<i32>} : memref<2x32xf32, #tpu.memory_space<vmem>>, vector<2x32xf32>,
    } else {
    }
    %c0 = arith.constant 0 : index
    %c0_1 = arith.constant 0 : index
    %c0_2 = arith.constant 0 : index
    %3 = vector.load %arg3[%c0, %c0_1, %c0_2] : memref<2x8x32xf32, #tpu.memory_space<vmem>>, vector<2x8x32xf32>
    %c0_3 = arith.constant 0 : index
    %c0_4 = arith.constant 0 : index
    %c0_5 = arith.constant 0 : index
    %4 = vector.load %arg4[%c0_3, %c0_4, %c0_5] : memref<2x8x1xi32, #tpu.memory_space<vmem>>, vector<2x8x1xi32>
    %c0_i32_6 = arith.constant 0 : i32
    %5 = vector.broadcast %c0_i32_6 : i32 to vector<2x8x1xi32>
    %6 = arith.cmpi ne, %4, %5 : vector<2x8x1xi32>
    %cst = arith.constant -1.000000e+04 : f32
    %7 = vector.shape_cast %6 : vector<2x8x1xi1> to vector<2x8x1xi1>
    %8 = vector.broadcast %7 : vector<2x8x1xi1> to vector<2x8x32xi1>
    %9 = vector.broadcast %cst : f32 to vector<2x8x32xf32>
    %10 = arith.select %8, %3, %9 : vector<2x8x32xi1>, vector<2x8x32xf32>
    %c0_7 = arith.constant 0 : index
    %c0_8 = arith.constant 0 : index
    %11 = vector.load %arg5[%c0_7, %c0_8] : memref<2x32xf32, #tpu.memory_space<vmem>>, vector<2x32xf32>
    %cst_9 = arith.constant dense<0xFF800000> : vector<2x32xf32>
    %12 = vector.multi_reduction <maximumf>, %10, %cst_9 [1] : vector<2x8x32xf32> to vector<2x32xf32>
    %13 = arith.maximumf %11, %12 : vector<2x32xf32>
    %c0_10 = arith.constant 0 : index
    %c0_11 = arith.constant 0 : index
    %14 = vector.load %arg5[%c0_10, %c0_11] : memref<2x32xf32, #tpu.memory_space<vmem>>, vector<2x32xf32>
    tpu.vector_store %arg5[%c0_10, %c0_11], %13 {strides = array<i32>} : memref<2x32xf32, #tpu.memory_space<vmem>>, vector<2x32xf32>,
    return
  }
  func.func @transform_0(%arg0: i32, %arg1: i32, %arg2: i32) -> (i32, i32, i32) {
    %c0_i32 = arith.constant 0 : i32
    return %arg0, %arg2, %arg1 : i32, i32, i32
  }
  func.func @transform_1(%arg0: i32, %arg1: i32, %arg2: i32) -> (i32, i32, i32) {
    %c0_i32 = arith.constant 0 : i32
    %c0_i32_0 = arith.constant 0 : i32
    return %arg0, %arg2, %c0_i32 : i32, i32, i32
  }
  func.func @transform_2(%arg0: i32, %arg1: i32, %arg2: i32) -> (i32, i32) {
    %c0_i32 = arith.constant 0 : i32
    return %arg0, %arg1 : i32, i32
  }
}

</mosaic_0001>

<bundles_post_ra>
// kernel: tpu_custom_call.1
= control target key start
LH: loop header
LB: loop body
LE: loop exit
PB: predicated region body
PF: predicated region fallthrough
CT: control target
= control target key end

     0   :  { %s141_s0 = inlined_call_operand.vmem [shape: f32[2,8,32], index: 0, kind: input, shape index: {}]   ;;  %s142_s1 = inlined_call_operand.vmem [shape: s32[2,8,1], index: 1, kind: input, shape index: {}]   ;;  %s143_s2 = inlined_call_operand.hbm [shape: f32[2,32], index: 2, kind: output, shape index: {}]  }
   0x1   :  { %v20_v0 = vld [vmem:[%s142_s1] sm:$0xff] }
   0x2   :  { %7 = vsyncpa [#allocation3], 0  ;;  %v106_v1 = vmov 0   ;;  %vm22_vm0 = vcmp.ne.s32.totalorder %v20_v0, 0  ;;  %v21_v3 = vld [vmem:[%s142_s1 + $0x8] sm:$0xff]  ;;  %vm16_vm2 = vcmask 254976  }
   0x3   :  { %79 = vset.pattern.permute.xlu0 %v106_v1  ;;  %v24_v2 = vsel %vm22_vm0, 1, %v106_v1  ;;  %vm23_vm1 = vcmp.ne.s32.totalorder %v21_v3, 0  ;;  %v107_v5 = vmov -inf   ;;  %v18_v6 = vld [vmem:[%s141_s0] sm:$0xff]  ;;  %vm37_vm3 = vcmask 261120   ;;  %v19_v12 = vld [vmem:[%s141_s0 + $0x8] sm:$0xff] }
   0x4   :  { %27 = vperm.xlu0 %79, %v24_v2   ;;  %v25_v4 = vsel %vm23_vm1, 1, %v106_v1  ;;  %17 = vst.msk [vmem:[#allocation2] sm:$0x3] %vm16_vm2, %v107_v5  ;;  %vm54_vm6 = vcmask 1041409   ;;  %s108_s16 = smov [#allocation2]   ;;  %s67_s19 = sshll.u32 %s143_s2, 4  ;;  %s68_s19 = int_to_ptr.hbm [resolvable:$true] %s67_s19 }
   0x5   :  { %s65_s17 = sshll.u32 %s108_s16, 4  ;;  %s66_s17 = int_to_ptr.vmem [resolvable:$true] %s65_s17 }
   0xb   :  { %v36_v26 = vld [vmem:[#allocation2] sm:$0x3] }
   0xc   :  { %30 = vperm.xlu0 %79, %v25_v4  }
  0x76   :  { %v28_v7 = vpop.permute.xlu0 %27 }
  0x77   :  { %vm32_vm4 = vcmp.eq.s32.totalorder %v28_v7, 1 }
  0x78   :  { %v34_v8 = vsel %vm32_vm4, %v18_v6, -10000.0 }
  0x79   :  { %v38_v9 = vsel %vm37_vm3, %v34_v8, -inf }
  0x7a   :  { %v39_v10 = vrot.slane %v38_v9, 4 }
  0x7c   :  { %v40_v11 = vmax.f32 %v38_v9, %v39_v10 }
  0x7e   :  { %v31_v13 = vpop.permute.xlu0 %30  ;;  %v41_v14 = vrot.slane %v40_v11, 2 }
  0x7f   :  { %vm33_vm5 = vcmp.eq.s32.totalorder %v31_v13, 1 }
  0x80   :  { %v35_v15 = vsel %vm33_vm5, %v19_v12, -10000.0  ;;  %v42_v18 = vmax.f32 %v40_v11, %v41_v14 }
  0x81   :  { %v45_v16 = vsel %vm37_vm3, %v35_v15, -inf }
  0x82   :  { %v46_v17 = vrot.slane %v45_v16, 4  ;;  %v43_v21 = vrot.slane %v42_v18, 1 }
  0x84   :  { %v47_v19 = vmax.f32 %v45_v16, %v46_v17  ;;  %v44_v24 = vmax.f32 %v42_v18, %v43_v21 }
  0x86   :  { %v48_v20 = vrot.slane %v47_v19, 2 }
  0x88   :  { %v49_v22 = vmax.f32 %v47_v19, %v48_v20 }
  0x8a   :  { %v50_v23 = vrot.slane %v49_v22, 1 }
  0x8c   :  { %v51_v25 = vmax.f32 %v49_v22, %v50_v23 }
  0x8e   :  { %v55_v27 = vsel %vm54_vm6, %v51_v25, %v44_v24 }
  0x8f   :  { %v57_v28 = vmax.f32 %v36_v26, %v55_v27 }
  0x91   :  { %59 = vst.msk [vmem:[#allocation2] sm:$0x3] %vm16_vm2, %v57_v28 }
  0x92   :  { %70 = dma.vmem_to_hbm [thread:$0]  %s66_s17, 32, %s68_s19, [#allocation3]  }
  0x93   :  { %104 = dma.done.wait [#allocation3], 32  }
  0x94   :  { %105 = vsyncadd [#allocation3], 4294967264 }
  0x95   :  { %75 = vsyncpa [#allocation3], 1 }

</bundles_post_ra>
